<compile_context>
chip_gen: v7x
topology: tpu7x:2x2x1
jax: 0.10.0
libtpu: 0.0.40
codegen_flags: <defaults>
</compile_context>

<pallas_src>
import jax
import jax.numpy as jnp
from jax.experimental import pallas as pl
from jax.experimental.pallas import tpu as pltpu

_LANES = 128


def _round_up(x, m):
    return ((x + m - 1) // m) * m


def global_max_pooling_3d(x, *, tb=256, tl=2048):
    """x: (N, C, D, H, W) -> (N, C), max over (D, H, W)."""
    N, C, D, H, W = x.shape
    B = N * C
    L = D * H * W
    xf = x.reshape(B, L)  # contiguous view of NCDHW: free, no HBM copy

    dtype = jnp.dtype(x.dtype)
    if jnp.issubdtype(dtype, jnp.floating):
        acc_dtype = jnp.float32
        acc_init = float("-inf")
    else:  # integer inputs: accumulate in int32
        acc_dtype = jnp.int32
        acc_init = int(jnp.iinfo(dtype).min)

    # Sublane packing: 8 rows/vreg for 4-byte dtypes, 16 for 2-byte, 32 for 1-byte.
    sub = 32 // dtype.itemsize
    tb_eff = max(sub, min(_round_up(tb, sub), _round_up(B, sub)))
    tl_eff = max(_LANES, min(_round_up(tl, _LANES), _round_up(L, _LANES)))

    grid_b = pl.cdiv(B, tb_eff)
    grid_l = pl.cdiv(L, tl_eff)
    n_chunks = tl_eff // _LANES
    mask_tail = (L % tl_eff) != 0  # last reduction block extends past L

    # Chunk j can only ever contain out-of-bounds columns in the last
    # reduction block; decide per chunk statically whether masking is needed.
    def _chunk_needs_mask(j):
        return mask_tail and ((grid_l - 1) * tl_eff + (j + 1) * _LANES > L)

    any_mask = any(_chunk_needs_mask(j) for j in range(n_chunks))

    def kernel(x_ref, o_ref, acc_ref):
        k = pl.program_id(1)

        @pl.when(k == 0)
        def _init():
            acc_ref[...] = jnp.full((tb_eff, _LANES), acc_init, acc_dtype)

        # Hoist the lane iota out of the chunk loop (no CSE across iterations).
        if any_mask:
            lane = jax.lax.broadcasted_iota(jnp.int32, (tb_eff, _LANES), 1)
            col_base = k * tl_eff + lane

        # Fold each 128-lane chunk into the accumulator element-wise (VPU only;
        # no cross-lane reduction in the hot loop).
        for j in range(n_chunks):
            chunk = x_ref[:, j * _LANES:(j + 1) * _LANES].astype(acc_dtype)
            if _chunk_needs_mask(j):
                col = col_base + j * _LANES
                chunk = jnp.where(col < L, chunk, acc_init)
            acc_ref[...] = jnp.maximum(acc_ref[...], chunk)

        @pl.when(k == pl.num_programs(1) - 1)
        def _store():
            o_ref[...] = acc_ref[...].astype(o_ref.dtype)

    out = pl.pallas_call(
        kernel,
        out_shape=jax.ShapeDtypeStruct((grid_b * tb_eff, _LANES), x.dtype),
        grid_spec=pltpu.PrefetchScalarGridSpec(
            num_scalar_prefetch=0,
            grid=(grid_b, grid_l),
            in_specs=[pl.BlockSpec((tb_eff, tl_eff), lambda i, k: (i, k))],
            out_specs=pl.BlockSpec((tb_eff, _LANES), lambda i, k: (i, 0)),
            scratch_shapes=[pltpu.VMEM((tb_eff, _LANES), acc_dtype)],
        ),
        compiler_params=pltpu.CompilerParams(
            dimension_semantics=("parallel", "arbitrary"),
        ),
    )(xf)

    # Final 128-wide lane reduction + un-flatten: tiny (B, 128) op in XLA.
    return jnp.max(out[:B], axis=-1).reshape(N, C)


if __name__ == "__main__":
    key = jax.random.PRNGKey(0)
    k1, k2 = jax.random.split(key)

    # Case 1: small, tile-aligned f32 input.
    x = jax.random.normal(k1, (2, 4, 8, 8, 8), dtype=jnp.float32)
    y = jax.block_until_ready(global_max_pooling_3d(x))
    y_ref = jnp.max(x, axis=(-3, -2, -1))
    assert y.shape == (2, 4), y.shape
    assert jnp.allclose(y, y_ref), "f32 mismatch vs reference"

    # Case 2: ragged shapes exercising the in-kernel tail mask + partial row tile.
    x2 = jax.random.normal(k2, (2, 3, 5, 7, 6), dtype=jnp.float32)
    y2 = jax.block_until_ready(global_max_pooling_3d(x2))
    y2_ref = jnp.max(x2, axis=(-3, -2, -1))
    assert y2.shape == (2, 3), y2.shape
    assert jnp.allclose(y2, y2_ref), "ragged f32 mismatch vs reference"

    # Case 3: bf16 input (16-row sublane packing, f32 accumulator).
    x3 = x.astype(jnp.bfloat16)
    y3 = jax.block_until_ready(global_max_pooling_3d(x3))
    y3_ref = jnp.max(x3, axis=(-3, -2, -1))
    assert y3.dtype == jnp.bfloat16
    assert jnp.allclose(y3.astype(jnp.float32), y3_ref.astype(jnp.float32)), \
        "bf16 mismatch vs reference"

    # Case 4: multi-tile reduction axis (L > tl) exercising accumulator carry.
    x4 = jax.random.normal(k2, (1, 2, 16, 16, 17), dtype=jnp.float32)
    y4 = jax.block_until_ready(global_max_pooling_3d(x4, tb=8, tl=1024))
    y4_ref = jnp.max(x4, axis=(-3, -2, -1))
    assert jnp.allclose(y4, y4_ref), "multi-block f32 mismatch vs reference"

    print("KERNEL_OK")
</pallas_src>

<mosaic_0001>
module attributes {stable_mosaic.version = 11 : i64} {
  func.func @kernel(%arg0: i32, %arg1: i32, %arg2: memref<8x512xf32, #tpu.memory_space<vmem>>, %arg3: memref<8x128xf32, #tpu.memory_space<vmem>>, %arg4: memref<8x128xf32, #tpu.memory_space<vmem>>) attributes {dimension_semantics = [#tpu.dimension_semantics<parallel>, #tpu.dimension_semantics<arbitrary>], iteration_bounds = array<i64: 1, 1>, scalar_prefetch = 0 : i64, scratch_operands = 1 : i64, tpu.core_type = #tpu.core_type<tc>, window_params = [{transform_indices = @transform_0, window_bounds = array<i64: 8, 512>}, {transform_indices = @transform_1, window_bounds = array<i64: 8, 128>}]} {
    %c0_i32 = arith.constant 0 : i32
    %0 = arith.cmpi eq, %arg1, %c0_i32 : i32
    %1 = arith.extui %0 : i1 to i32
    %c0_i32_0 = arith.constant 0 : i32
    %2 = arith.cmpi ne, %1, %c0_i32_0 : i32
    scf.if %2 {
      %cst = arith.constant 0xFF800000 : f32
      %22 = vector.broadcast %cst : f32 to vector<8x128xf32>
      %c0_23 = arith.constant 0 : index
      %c0_24 = arith.constant 0 : index
      %23 = vector.load %arg4[%c0_23, %c0_24] : memref<8x128xf32, #tpu.memory_space<vmem>>, vector<8x128xf32>
      tpu.vector_store %arg4[%c0_23, %c0_24], %22 {strides = array<i32>} : memref<8x128xf32, #tpu.memory_space<vmem>>, vector<8x128xf32>,
    } else {
    }
    %c0 = arith.constant 0 : index
    %c0_1 = arith.constant 0 : index
    %3 = vector.load %arg2[%c0, %c0_1] : memref<8x512xf32, #tpu.memory_space<vmem>>, vector<8x128xf32>
    %c0_2 = arith.constant 0 : index
    %c0_3 = arith.constant 0 : index
    %4 = vector.load %arg4[%c0_2, %c0_3] : memref<8x128xf32, #tpu.memory_space<vmem>>, vector<8x128xf32>
    %5 = arith.maximumf %4, %3 : vector<8x128xf32>
    %c0_4 = arith.constant 0 : index
    %c0_5 = arith.constant 0 : index
    %6 = vector.load %arg4[%c0_4, %c0_5] : memref<8x128xf32, #tpu.memory_space<vmem>>, vector<8x128xf32>
    tpu.vector_store %arg4[%c0_4, %c0_5], %5 {strides = array<i32>} : memref<8x128xf32, #tpu.memory_space<vmem>>, vector<8x128xf32>,
    %c0_6 = arith.constant 0 : index
    %c128 = arith.constant 128 : index
    %7 = vector.load %arg2[%c0_6, %c128] : memref<8x512xf32, #tpu.memory_space<vmem>>, vector<8x128xf32>
    %c0_7 = arith.constant 0 : index
    %c0_8 = arith.constant 0 : index
    %8 = vector.load %arg4[%c0_7, %c0_8] : memref<8x128xf32, #tpu.memory_space<vmem>>, vector<8x128xf32>
    %9 = arith.maximumf %8, %7 : vector<8x128xf32>
    %c0_9 = arith.constant 0 : index
    %c0_10 = arith.constant 0 : index
    %10 = vector.load %arg4[%c0_9, %c0_10] : memref<8x128xf32, #tpu.memory_space<vmem>>, vector<8x128xf32>
    tpu.vector_store %arg4[%c0_9, %c0_10], %9 {strides = array<i32>} : memref<8x128xf32, #tpu.memory_space<vmem>>, vector<8x128xf32>,
    %c0_11 = arith.constant 0 : index
    %c256 = arith.constant 256 : index
    %11 = vector.load %arg2[%c0_11, %c256] : memref<8x512xf32, #tpu.memory_space<vmem>>, vector<8x128xf32>
    %c0_12 = arith.constant 0 : index
    %c0_13 = arith.constant 0 : index
    %12 = vector.load %arg4[%c0_12, %c0_13] : memref<8x128xf32, #tpu.memory_space<vmem>>, vector<8x128xf32>
    %13 = arith.maximumf %12, %11 : vector<8x128xf32>
    %c0_14 = arith.constant 0 : index
    %c0_15 = arith.constant 0 : index
    %14 = vector.load %arg4[%c0_14, %c0_15] : memref<8x128xf32, #tpu.memory_space<vmem>>, vector<8x128xf32>
    tpu.vector_store %arg4[%c0_14, %c0_15], %13 {strides = array<i32>} : memref<8x128xf32, #tpu.memory_space<vmem>>, vector<8x128xf32>,
    %c0_16 = arith.constant 0 : index
    %c384 = arith.constant 384 : index
    %15 = vector.load %arg2[%c0_16, %c384] : memref<8x512xf32, #tpu.memory_space<vmem>>, vector<8x128xf32>
    %c0_17 = arith.constant 0 : index
    %c0_18 = arith.constant 0 : index
    %16 = vector.load %arg4[%c0_17, %c0_18] : memref<8x128xf32, #tpu.memory_space<vmem>>, vector<8x128xf32>
    %17 = arith.maximumf %16, %15 : vector<8x128xf32>
    %c0_19 = arith.constant 0 : index
    %c0_20 = arith.constant 0 : index
    %18 = vector.load %arg4[%c0_19, %c0_20] : memref<8x128xf32, #tpu.memory_space<vmem>>, vector<8x128xf32>
    tpu.vector_store %arg4[%c0_19, %c0_20], %17 {strides = array<i32>} : memref<8x128xf32, #tpu.memory_space<vmem>>, vector<8x128xf32>,
    %c0_i32_21 = arith.constant 0 : i32
    %19 = arith.cmpi eq, %arg1, %c0_i32_21 : i32
    %20 = arith.extui %19 : i1 to i32
    %c0_i32_22 = arith.constant 0 : i32
    %21 = arith.cmpi ne, %20, %c0_i32_22 : i32
    scf.if %21 {
      %c0_23 = arith.constant 0 : index
      %c0_24 = arith.constant 0 : index
      %22 = vector.load %arg4[%c0_23, %c0_24] : memref<8x128xf32, #tpu.memory_space<vmem>>, vector<8x128xf32>
      %c0_25 = arith.constant 0 : index
      %c0_26 = arith.constant 0 : index
      %23 = vector.load %arg3[%c0_25, %c0_26] : memref<8x128xf32, #tpu.memory_space<vmem>>, vector<8x128xf32>
      tpu.vector_store %arg3[%c0_25, %c0_26], %22 {strides = array<i32>} : memref<8x128xf32, #tpu.memory_space<vmem>>, vector<8x128xf32>,
    } else {
    }
    return
  }
  func.func @transform_0(%arg0: i32, %arg1: i32) -> (i32, i32) {
    %c0_i32 = arith.constant 0 : i32
    return %arg0, %arg1 : i32, i32
  }
  func.func @transform_1(%arg0: i32, %arg1: i32) -> (i32, i32) {
    %c0_i32 = arith.constant 0 : i32
    %c0_i32_0 = arith.constant 0 : i32
    return %arg0, %c0_i32 : i32, i32
  }
}

</mosaic_0001>

<bundles_post_ra>
// kernel: tpu_custom_call.1
= control target key start
LH: loop header
LB: loop body
LE: loop exit
PB: predicated region body
PF: predicated region fallthrough
CT: control target
= control target key end

     0   :  { %6 = vsyncpa [#allocation4], 0  ;;  %s148_s0 = inlined_call_operand.hbm [shape: f32[8,512], index: 0, kind: input, shape index: {}]   ;;  %s149_s1 = inlined_call_operand.hbm [shape: f32[8,128], index: 1, kind: output, shape index: {}]  }
   0x1   :  { %7 = vsyncpa [#allocation5], 0  ;;  %s112_s6 = smov [#allocation3]   ;;  %s64_s10 = scalar_lea.hbm %s148_s0, 512 }
   0x2   :  { %s14_s7 = sshll.u32 %s112_s6, 4  ;;  %p65_p0 = scmp.ne.s32.totalorder %s148_s0, %s64_s10  ;;  %s15_s7 = int_to_ptr.vmem [resolvable:$true] %s14_s7 }
   0x3   :  { %p68_p1 = scmp.lt.u32.totalorder %s64_s10, %s148_s0 }
   0x5   :  { %p70_p2 = pnand %p68_p1, %p65_p0 }
   0x7   :  { %73 = shalt.err (!%p70_p2)
}
   0x8   :  { %s74_s15 = scalar_lea.vmem %s15_s7, 512  ;;  %p79_p4 = scmp.lt.s32.totalorder %s15_s7, %s15_s7 }
   0x9   :  { %p75_p3 = scmp.ne.s32.totalorder %s15_s7, %s74_s15  ;;  %p80_p5 = scmp.lt.s32.totalorder %s74_s15, %s74_s15 }
   0xb   :  { %p81_p6 = por %p80_p5, %p79_p4 }
   0xd   :  { %p82_p7 = pnand %p81_p6, %p75_p3 }
   0xf   :  { %85 = shalt.err (!%p82_p7)
}
  0x10   :  { %17 = dma.hbm_to_vmem [thread:$0]  %s148_s0, 512, %s15_s7, [#allocation4]  }
  0x11   :  { %108 = dma.done.wait [#allocation4], 512  }
  0x12   :  { %109 = vsyncadd [#allocation4], 4294966784  ;;  %v26_v0 = vld [vmem:[#allocation3] sm:$0xff]  ;;  %v30_v1 = vld [vmem:[#allocation3 + $0x8] sm:$0xff]  ;;  %s113_s18 = smov [#allocation6]  }
  0x13   :  { %v34_v2 = vld [vmem:[#allocation3 + $0x10] sm:$0xff]  ;;  %v32_v3 = vmax.f32 %v26_v0, %v30_v1  ;;  %v38_v4 = vld [vmem:[#allocation3 + $0x18] sm:$0xff]  ;;  %s53_s19 = sshll.u32 %s113_s18, 4  ;;  %s54_s19 = int_to_ptr.vmem [resolvable:$true] %s53_s19 }
  0x14   :  { %s86_s20 = scalar_lea.vmem %s54_s19, 128  ;;  %p91_p9 = scmp.lt.s32.totalorder %s54_s19, %s54_s19 }
  0x15   :  { %v36_v5 = vmax.f32 %v32_v3, %v34_v2  ;;  %p87_p8 = scmp.ne.s32.totalorder %s54_s19, %s86_s20  ;;  %p92_p10 = scmp.lt.s32.totalorder %s86_s20, %s86_s20 }
  0x17   :  { %v40_v6 = vmax.f32 %v36_v5, %v38_v4  ;;  %p93_p11 = por %p92_p10, %p91_p9 }
  0x19   :  { %46 = vst [vmem:[#allocation6] sm:$0xff] %v40_v6  ;;  %p94_p12 = pnand %p93_p11, %p87_p8 }
  0x1b   :  { %97 = shalt.err (!%p94_p12)
}
  0x1c   :  { %s98_s22 = scalar_lea.hbm %s149_s1, 128 }
  0x1d   :  { %p99_p13 = scmp.ne.s32.totalorder %s149_s1, %s98_s22  ;;  %p102_p0 = scmp.lt.u32.totalorder %s98_s22, %s149_s1 }
  0x1f   :  { %p104_p1 = pnand %p102_p0, %p99_p13 }
  0x21   :  { %107 = shalt.err (!%p104_p1)
}
  0x22   :  { %56 = dma.vmem_to_hbm [thread:$0]  %s54_s19, 128, %s149_s1, [#allocation5]  }
  0x23   :  { %110 = dma.done.wait [#allocation5], 128  }
  0x24   :  { %111 = vsyncadd [#allocation5], 4294967168 }
  0x25   :  { %60 = vsyncpa [#allocation4], 1 }
  0x26   :  { %61 = vsyncpa [#allocation5], 1 }

</bundles_post_ra>
